<compile_context>
chip_gen: v7x
topology: tpu7x:2x2x1
jax: 0.10.0
libtpu: 0.0.40
codegen_flags: <defaults>
</compile_context>

<pallas_src>
import functools

import jax
import jax.numpy as jnp
from jax.experimental import pallas as pl
from jax.experimental.pallas import tpu as pltpu


def _round_up(x, m):
    return ((x + m - 1) // m) * m


def _vmem_capacity_bytes():
    """Generation-aware VMEM capacity; falls back to the smallest (v7x per-TC) value."""
    try:
        cap = getattr(pltpu.get_tpu_info(), "vmem_capacity_bytes", None)
        if cap:
            return int(cap)
    except Exception:
        pass
    return 64 * 1024 * 1024


def _patch_embed_kernel(patches_ref, w_ref, pos_ref, out_ref):
    # patches_ref: (TB, TN, P)  w_ref: (P, E)  pos_ref: (1, TN, E)  out_ref: (TB, TN, E)
    TB, TN, P = patches_ref.shape
    E = out_ref.shape[-1]
    # Merge (TB, TN) into a single row axis.  Layout-free by construction:
    # either TB == 1 (pure squeeze) or TN % 8 == 0 (sublane-aligned concat).
    x2 = patches_ref[...].reshape(TB * TN, P)
    acc = jnp.dot(
        x2,
        w_ref[...],
        preferred_element_type=jnp.float32,
        precision=jax.lax.Precision.HIGHEST,
    )  # (TB*TN, E): one MXU call for the whole block
    out = acc.reshape(TB, TN, E) + pos_ref[...]  # pos (bias folded) broadcast over TB
    out_ref[...] = out.astype(out_ref.dtype)


def prepare_patch_embed_params(weight, bias, pos):
    """One-time parameter transforms (hoisted out of the per-call hot path)."""
    E, _, P = weight.shape
    w_t = weight.reshape(E, P).T.astype(jnp.float32)  # (P, E)
    pos_fold = pos.astype(jnp.float32) + bias.astype(jnp.float32)[None, None, :]
    return w_t, pos_fold


@functools.partial(jax.jit, static_argnames=("p_size",))
def patch_embed_forward(x, w_t, pos_fold, *, p_size):
    """x: (B, 1, L); w_t: (P, E); pos_fold: (1, N, E). Returns (B, N, E) float32."""
    B, c_in, L = x.shape
    assert c_in == 1
    P = p_size
    N = L // P
    assert N * P == L
    P_, E = w_t.shape
    assert P_ == P and pos_fold.shape == (1, N, E)

    patches = x.reshape(B, N, P).astype(jnp.float32)  # metadata-only reshape

    # ---- generation-aware tile sizing ---------------------------------------
    vmem_cap = _vmem_capacity_bytes()
    out_budget = max(vmem_cap // 16, 512 * 1024)  # ~4 MiB on v7x, ~8 MiB on v5e/v6e
    e_lanes = _round_up(E, 128)
    # per-row VMEM cost: f32 output row (e_lanes lanes) + lane-padded patches row (128)
    rows_cap = max(8, (out_budget // (4 * (e_lanes + 128))) // 8 * 8)

    if N <= rows_cap:
        TN = N  # full dim -> always a legal block shape
        TB = max(1, min(B, rows_cap // TN)) if N % 8 == 0 else 1
    else:
        TN = rows_cap  # multiple of 8; last N-block is ragged (handled by Pallas)
        TB = 1

    n_tiles = pl.cdiv(N, TN)
    b_tiles = pl.cdiv(B, TB)

    # Ensure >= 2 grid steps when possible so both v7x TensorCores get work
    # (costs only ~0.35us of extra per-step overhead on single-core chips).
    if n_tiles * b_tiles < 2:
        if B >= 2:
            TB = (B + 1) // 2  # N % 8 == 0 here, so the merged reshape stays free
            b_tiles = pl.cdiv(B, TB)
        elif N > 8:
            tn_half = _round_up((N + 1) // 2, 8)
            if tn_half < N:
                TN = tn_half
                n_tiles = pl.cdiv(N, TN)

    cost = pl.CostEstimate(
        flops=2 * B * N * P * E,
        transcendentals=0,
        bytes_accessed=4 * (B * N * P + P * E + N * E + B * N * E),
    )

    out = pl.pallas_call(
        _patch_embed_kernel,
        out_shape=jax.ShapeDtypeStruct((B, N, E), jnp.float32),
        grid_spec=pltpu.PrefetchScalarGridSpec(
            num_scalar_prefetch=0,
            # batch-tile axis innermost: weight and pos tile stay resident across it
            grid=(n_tiles, b_tiles),
            in_specs=[
                pl.BlockSpec((TB, TN, P), lambda nt, bt: (bt, nt, 0)),
                pl.BlockSpec((P, E), lambda nt, bt: (0, 0)),
                pl.BlockSpec((1, TN, E), lambda nt, bt: (0, nt, 0)),
            ],
            out_specs=pl.BlockSpec((TB, TN, E), lambda nt, bt: (bt, nt, 0)),
        ),
        compiler_params=pltpu.CompilerParams(
            dimension_semantics=("parallel", "parallel"),
            vmem_limit_bytes=vmem_cap // 2,
        ),
        cost_estimate=cost,
    )(patches, w_t, pos_fold)

    return out


def _reference(x, weight, bias, pos, p_size):
    B, _, L = x.shape
    E = weight.shape[0]
    N = L // p_size
    return (
        jnp.einsum(
            "bnp,pe->bne",
            x.reshape(B, N, p_size),
            weight.reshape(E, p_size).T,
            precision=jax.lax.Precision.HIGHEST,
        )
        + bias[None, None, :]
        + pos
    )


if __name__ == "__main__":
    key = jax.random.PRNGKey(0)
    k_x, k_w, k_b, k_pos, k_x2, k_w2, k_b2, k_pos2 = jax.random.split(key, 8)

    # ---- main case: shapes consistent with the module -----------------------
    B, N, E, P = 2, 8, 32, 4
    L = N * P
    x = jax.random.normal(k_x, (B, 1, L), dtype=jnp.float32)
    weight = jax.random.uniform(k_w, (E, 1, P), dtype=jnp.float32, minval=-0.5, maxval=0.5)
    bias = jax.random.uniform(k_b, (E,), dtype=jnp.float32, minval=-0.5, maxval=0.5)
    pos = jax.random.uniform(k_pos, (1, N, E), dtype=jnp.float32)

    w_t, pos_fold = prepare_patch_embed_params(weight, bias, pos)  # one-time transform
    out = patch_embed_forward(x, w_t, pos_fold, p_size=P)
    out = jax.block_until_ready(out)

    ref = _reference(x, weight, bias, pos, P)
    assert out.shape == (B, N, E)
    assert out.dtype == jnp.float32
    assert jnp.allclose(out, ref, atol=1e-5, rtol=1e-5)

    # ---- second case: ragged batch tile (TB=2 over B=3) + non-128-aligned E --
    B2, N2, E2, P2 = 3, 8, 48, 6
    L2 = N2 * P2
    x2 = jax.random.normal(k_x2, (B2, 1, L2), dtype=jnp.float32)
    weight2 = jax.random.uniform(k_w2, (E2, 1, P2), dtype=jnp.float32, minval=-0.5, maxval=0.5)
    bias2 = jax.random.uniform(k_b2, (E2,), dtype=jnp.float32, minval=-0.5, maxval=0.5)
    pos2 = jax.random.uniform(k_pos2, (1, N2, E2), dtype=jnp.float32)

    w_t2, pos_fold2 = prepare_patch_embed_params(weight2, bias2, pos2)
    out2 = jax.block_until_ready(patch_embed_forward(x2, w_t2, pos_fold2, p_size=P2))
    ref2 = _reference(x2, weight2, bias2, pos2, P2)
    assert out2.shape == (B2, N2, E2)
    assert jnp.allclose(out2, ref2, atol=1e-5, rtol=1e-5)

    print("KERNEL_OK")
</pallas_src>

<mosaic_0001>
module attributes {stable_mosaic.version = 11 : i64} {
  func.func @_patch_embed_kernel(%arg0: i32, %arg1: i32, %arg2: memref<1x8x4xf32, #tpu.memory_space<vmem>>, %arg3: memref<4x32xf32, #tpu.memory_space<vmem>>, %arg4: memref<1x8x32xf32, #tpu.memory_space<vmem>>, %arg5: memref<1x8x32xf32, #tpu.memory_space<vmem>>) attributes {dimension_semantics = [#tpu.dimension_semantics<parallel>, #tpu.dimension_semantics<parallel>], iteration_bounds = array<i64: 1, 2>, scalar_prefetch = 0 : i64, scratch_operands = 0 : i64, tpu.core_type = #tpu.core_type<tc>, window_params = [{transform_indices = @transform_0, window_bounds = array<i64: 1, 8, 4>}, {pipeline_mode = #tpu.pipeline_mode<synchronous>, transform_indices = @transform_1, window_bounds = array<i64: 4, 32>}, {transform_indices = @transform_2, window_bounds = array<i64: 1, 8, 32>}, {transform_indices = @transform_3, window_bounds = array<i64: 1, 8, 32>}]} {
    %c0 = arith.constant 0 : index
    %c0_0 = arith.constant 0 : index
    %c0_1 = arith.constant 0 : index
    %0 = vector.load %arg2[%c0, %c0_0, %c0_1] : memref<1x8x4xf32, #tpu.memory_space<vmem>>, vector<1x8x4xf32>
    %1 = vector.shape_cast %0 : vector<1x8x4xf32> to vector<8x4xf32>
    %c0_2 = arith.constant 0 : index
    %c0_3 = arith.constant 0 : index
    %2 = vector.load %arg3[%c0_2, %c0_3] : memref<4x32xf32, #tpu.memory_space<vmem>>, vector<4x32xf32>
    %cst = arith.constant dense<0.000000e+00> : vector<8x32xf32>
    %3 = tpu.matmul %1, %2, %cst {dimension_numbers = #tpu.dot_dimension_numbers<[1], [0], [0], [1], [0, 0, 1, 1], [], []>, precision = #tpu.contract_precision<fp32>} : vector<8x4xf32>, vector<4x32xf32>, vector<8x32xf32> -> vector<8x32xf32>
    %4 = vector.shape_cast %3 : vector<8x32xf32> to vector<1x8x32xf32>
    %c0_4 = arith.constant 0 : index
    %c0_5 = arith.constant 0 : index
    %c0_6 = arith.constant 0 : index
    %5 = vector.load %arg4[%c0_4, %c0_5, %c0_6] : memref<1x8x32xf32, #tpu.memory_space<vmem>>, vector<1x8x32xf32>
    %6 = arith.addf %4, %5 : vector<1x8x32xf32>
    %c0_7 = arith.constant 0 : index
    %c0_8 = arith.constant 0 : index
    %c0_9 = arith.constant 0 : index
    %7 = vector.load %arg5[%c0_7, %c0_8, %c0_9] : memref<1x8x32xf32, #tpu.memory_space<vmem>>, vector<1x8x32xf32>
    tpu.vector_store %arg5[%c0_7, %c0_8, %c0_9], %6 {strides = array<i32>} : memref<1x8x32xf32, #tpu.memory_space<vmem>>, vector<1x8x32xf32>,
    return
  }
  func.func @transform_0(%arg0: i32, %arg1: i32) -> (i32, i32, i32) {
    %c0_i32 = arith.constant 0 : i32
    %c0_i32_0 = arith.constant 0 : i32
    return %arg1, %arg0, %c0_i32 : i32, i32, i32
  }
  func.func @transform_1(%arg0: i32, %arg1: i32) -> (i32, i32) {
    %c0_i32 = arith.constant 0 : i32
    %c0_i32_0 = arith.constant 0 : i32
    %c0_i32_1 = arith.constant 0 : i32
    return %c0_i32, %c0_i32_0 : i32, i32
  }
  func.func @transform_2(%arg0: i32, %arg1: i32) -> (i32, i32, i32) {
    %c0_i32 = arith.constant 0 : i32
    %c0_i32_0 = arith.constant 0 : i32
    %c0_i32_1 = arith.constant 0 : i32
    return %c0_i32, %arg0, %c0_i32_0 : i32, i32, i32
  }
  func.func @transform_3(%arg0: i32, %arg1: i32) -> (i32, i32, i32) {
    %c0_i32 = arith.constant 0 : i32
    %c0_i32_0 = arith.constant 0 : i32
    return %arg1, %arg0, %c0_i32 : i32, i32, i32
  }
}

</mosaic_0001>

<bundles_post_ra>
// kernel: patch_embed_forward.1
= control target key start
LH: loop header
LB: loop body
LE: loop exit
PB: predicated region body
PF: predicated region fallthrough
CT: control target
= control target key end

     0   :  { %8 = vsyncpa [#allocation3], 0  ;;  %s1107_s0 = inlined_call_operand.vmem [shape: f32[2,8,4], index: 0, kind: input, shape index: {}]   ;;  %s1108_s1 = inlined_call_operand.vmem [shape: f32[4,32], index: 1, kind: input, shape index: {}]   ;;  %s1109_s2 = inlined_call_operand.vmem [shape: f32[1,8,32], index: 2, kind: input, shape index: {}]   ;;  %s1110_s3 = inlined_call_operand.hbm [shape: f32[2,8,32], index: 3, kind: output, shape index: {}]  }
   0x1   :  { %10 = vsyncpa [#allocation3 + $0x1], 0  ;;  %s983_s12 = smov 0   ;;  %s985_s13 = smov 0  }
   0x2   :  { %s987_s14 = smov 0   ;;  %s989_s15 = smov 0  }
   0x3   :  { %s991_s16 = smov 0   ;;  %s993_s17 = smov 0  }
   0x4 LB: > { %s769_s18 = sadd.s32 4294967295, %s958_s17   ;;  %s770_s19 = sadd.s32 4294967294, %s958_s17   ;;  %s958_s17 = sphi %s993_s17, %s16_s17   ;;  %s954_s16 = sphi %s991_s16, %s1117_s16   ;;  %s950_s15 = sphi %s989_s15, %s1116_s15   ;;  %s946_s14 = sphi %s987_s14, %s1115_s14   ;;  %s942_s13 = sphi %s985_s13, %s1114_s13   ;;  %s938_s12 = sphi %s983_s12, %s1113_s12  }
   0x5   : > { %s25_s20 = sadd.s32 1, %s954_s16  ;;  %s112_s21 = sadd.s32 1, %s946_s14 }
   0x6   : > { %p26_p0 = scmp.ge.s32.totalorder %s25_s20, 2  ;;  %p122_p1 = scmp.ne.s32.totalorder %s946_s14, %s942_s13 }
   0x7   : > { %p123_p2 = scmp.eq.s32.totalorder %s769_s18, 1  ;;  %p128_p3 = scmp.ne.s32.totalorder %s942_s13, %s938_s12 }
   0x8   : > { %s1119_s20 = smov (%p26_p0, %s25_s20), 0  ;;  %p129_p5 = scmp.eq.s32.totalorder %s770_s19, 1 }
   0x9   : > { %p1023_p4 = por %p123_p2, %p122_p1  ;;  %s107_s23 = ssub.s32 %s954_s16, %s1119_s20 }
   0xa   : > { %p774_p6 = scmp.ge.s32.totalorder %s958_s17, 1  ;;  %p110_p7 = scmp.eq.s32.totalorder %s107_s23, 0 }
   0xb   : > { %p1030_p8 = por %p129_p5, %p128_p3  ;;  %p167_p9 = scmp.lt.s32.totalorder %s958_s17, 3 }
   0xc   : > { %s1036_s25 = scalar_select %p110_p7, %s946_s14, %s112_s21  }
   0xd   : > { %p168_p10 = pnand %p774_p6, %p167_p9 }
   0xe   : > { %v209_v0 = vld [vmem:[%s1108_s1] sm:$0xf] (!%p168_p10)  ;;  %vm214_vm0 = vcmask (!%p168_p10), 1043456   ;;  %p197_p11 = scmp.lt.s32.totalorder (!%p168_p10), %s950_s15, 1  ;;  %v960_v1 = vmov (!%p168_p10), 0.0   ;;  %vm961_vm1 = vmmov (!%p168_p10), 0  }
   0xf   : > { %171 = sbr.rel (%p168_p10) target bundleno = 278 (0x116), region = 32  ;;  %793 = vmatprep.subr.mxu0 (!%p168_p10), %v960_v1  ;;  %v216_v2 = vsel (!%p168_p10), %vm214_vm0, %v209_v0, 0  ;;  %798 = vmatprep.subr.mxu1 (!%p168_p10), %v960_v1  ;;  %vm210_vm2 = vcmask (!%p168_p10), 31744   ;;  %s194_s6 = sand.u32 (!%p168_p10), 1, %s942_s13   ;;  %v664_v31 = vld [vmem:[%s1109_s2] sm:$0xff] (!%p168_p10)  ;;  %vm666_vm3 = vcmask (!%p168_p10), 261120  }
  0x10   : > { %v219_v3 = vand.u32 (!%p168_p10), 4294901760, %v216_v2  ;;  %795 = vmatprep.mubr.msk.f32.mxu0 (!%p168_p10), %vm961_vm1, %v960_v1  ;;  %800 = vmatprep.mubr.msk.f32.mxu1 (!%p168_p10), %vm961_vm1, %v960_v1  ;;  %s775_s7 = sshll.u32 (!%p168_p10), %s194_s6, 3  ;;  %s778_s10 = sshll.u32 (!%p168_p10), %s950_s15, 7 }
  0x11   : > { %s196_s11 = scalar_lea.vmem (!%p168_p10), [#allocation2], %s775_s7  ;;  %s1060_s23 = scalar_lea.hbm (!%p168_p10), %s1110_s3, %s778_s10 }
  0x12   : > { %794 = vmatpush3.msra.mxu0 (!%p168_p10), %v219_v3  ;;  %v296_v4 = vsub.f32 (!%p168_p10), %v216_v2, %v219_v3  ;;  %s683_s18 = sshll.u32 (!%p168_p10), %s196_s11, 4  ;;  %s669_s26 = scalar_lea.sflag (!%p168_p10), [#allocation3], %s194_s6  ;;  %s1062_s18 = int_to_ptr.vmem [resolvable:$true] %s683_s18 }
  0x13   : > { %803 = vmatprep.subr.mxu0 (!%p168_p10), %v960_v1  ;;  %s880_s27 = scalar_lea.vmem (!%p168_p10), %s1062_s18, 128 }
  0x14   : > { %v297_v5 = vand.u32 (!%p168_p10), 4294901760, %v296_v4  ;;  %p881_p12 = scmp.ne.s32.totalorder (!%p168_p10), %s1062_s18, %s880_s27 }
  0x16   : > { %s198_s28 = scalar_select %p197_p11, %s950_s15, 1  ;;  %v298_v8 = vsub.f32 %v296_v4, %v297_v5 }
  0x17   : > { %p882_p13 = pnand %p881_p12, %p1023_p4  ;;  %s962_s15 = smov [#allocation2]  }
  0x18   : > { %s776_s29 = sshll.u32 %s198_s28, 3  ;;  %v299_v10 = vand.u32 4294901760, %v298_v8  ;;  %s884_s28 = sshll.u32 %s962_s15, 4  ;;  %s885_s28 = int_to_ptr.vmem [resolvable:$false] %s884_s28 }
  0x19   : > { %s203_s5 = scalar_lea.vmem %s1107_s0, %s776_s29  ;;  %p883_p0 = pneg %p882_p13 }
  0x1a   : > { %v208_v6 = vld [vmem:[%s203_s5] sm:$0xff]  ;;  %799 = vmatpush3.msra.mxu1 %v299_v10  ;;  %s886_s29 = scalar_lea.vmem %s885_s28, 256  ;;  %p887_p1 = scmp.lt.s32.totalorder %s1062_s18, %s885_s28 }
  0x1b   : > { %v212_v7 = vsel %vm210_vm2, %v208_v6, 0  ;;  %808 = vmatprep.subr.mxu1 %v960_v1  ;;  %p888_p2 = scmp.lt.s32.totalorder %s886_s29, %s880_s27 }
  0x1c   : > { %v284_v9 = vand.u32 4294901760, %v212_v7 }
  0x1d   : > { %p889_p3 = por %p888_p2, %p887_p1 }
  0x1e   : > { %v285_v11 = vsub.f32 %v212_v7, %v284_v9  ;;  %801 = vmatmul.mubr.f32.vlgmr.msra.gmra.mrb[0].mxu1 %v284_v9 }
  0x1f   : > { %809 = vmatpush3.msra.mxu1 %v219_v3  ;;  %810 = vmatprep.mubr.msk.f32.mxu1 %vm961_vm1, %v960_v1  ;;  %p890_p5 = pnand %p889_p3, %p883_p0 }
  0x20   : > { %v286_v12 = vand.u32 4294901760, %v285_v11  ;;  %818 = vmatprep.subr.mxu1 %v960_v1 }
  0x22   : > { %v287_v13 = vsub.f32 %v285_v11, %v286_v12  ;;  %811 = vmatmul.mubr.f32.vlgmr.msra.gmra.mrb[2].mxu1 %v286_v12 }
  0x23   : > { %819 = vmatpush3.msra.mxu1 %v219_v3  ;;  %820 = vmatprep.mubr.msk.f32.mxu1 %vm961_vm1, %v960_v1 }
  0x24   : > { %v288_v14 = vand.u32 4294901760, %v287_v13 }
  0x26   : > { %796 = vmatmul.mubr.f32.vlgmr.msra.gmra.mrb[0].mxu0 %v288_v14  ;;  %821 = vmatmul.mubr.f32.vlgmr.msra.gmra.mrb[4].mxu1 %v284_v9 }
  0x27   : > { %804 = vmatpush3.msra.mxu0 %v296_v4  ;;  %805 = vmatprep.mubr.msk.f32.mxu0 %vm961_vm1, %v960_v1 }
  0x28   : > { %813 = vmatprep.subr.mxu0 %v960_v1 }
  0x2a   : > { %806 = vmatmul.mubr.f32.vlgmr.msra.gmra.mrb[2].mxu0 %v285_v11 }
  0x2b   : > { %814 = vmatpush3.msra.mxu0 %v297_v5  ;;  %815 = vmatprep.mubr.msk.f32.mxu0 %vm961_vm1, %v960_v1 }
  0x2e   : > { %816 = vmatmul.mubr.f32.vlgmr.msra.gmra.mrb[4].mxu0 %v284_v9 }
  0xf1   : > { %v366_v15 = vpop.f32.mrb[0].mxu1 }
  0xf2   : > { %v802_v16 = vpop.f32.mrb[1].mxu1 }
  0xf5   : > { %v514_v17 = vpop.f32.mrb[2].mxu1 }
  0xf6   : > { %v812_v19 = vpop.f32.mrb[3].mxu1 }
  0xf9   : > { %v290_v18 = vpop.f32.mrb[0].mxu0  ;;  %v660_v22 = vpop.f32.mrb[4].mxu1 }
  0xfa   : > { %v367_v20 = vadd.f32 %v366_v15, %v290_v18  ;;  %v797_v21 = vpop.f32.mrb[1].mxu0  ;;  %v822_v24 = vpop.f32.mrb[5].mxu1 }
  0xfd   : > { %v440_v23 = vpop.f32.mrb[2].mxu0 }
  0xfe   : > { %v441_v25 = vadd.f32 %v440_v23, %v367_v20  ;;  %v807_v26 = vpop.f32.mrb[3].mxu0 }
 0x100   : > { %v515_v27 = vadd.f32 %v514_v17, %v441_v25 }
 0x101   : > { %v588_v28 = vpop.f32.mrb[4].mxu0 }
 0x102   : > { %v589_v29 = vadd.f32 %v588_v28, %v515_v27  ;;  %v817_v30 = vpop.f32.mrb[5].mxu0 }
 0x104   : > { %v661_v32 = vadd.f32 %v660_v22, %v589_v29 }
 0x106   : > { %v665_v33 = vadd.f32 %v664_v31, %v661_v32 }
 0x108   : > { %667 = vst.msk [vmem:[%s196_s11] sm:$0xff] %vm666_vm3, %v665_v33 }
 0x109   : > { %893 = shalt.err (!%p890_p5)
}
 0x10a   : > { %s894_s30 = scalar_lea.hbm %s1060_s23, 128  ;;  %s898_s6 = scalar_lea.hbm %s1110_s3, 256 }
 0x10b   : > { %p895_p6 = scmp.ne.s32.totalorder %s1060_s23, %s894_s30  ;;  %p899_p10 = scmp.lt.u32.totalorder %s1060_s23, %s1110_s3 }
 0x10c   : > { %p900_p11 = scmp.lt.u32.totalorder %s898_s6, %s894_s30  ;;  %p902_p13 = scmp.lt.u32.totalorder %s894_s30, %s1060_s23 }
 0x10d   : > { %p896_p7 = pnand %p895_p6, %p1023_p4 }
 0x10e   : > { %p901_p12 = por %p900_p11, %p899_p10 }
 0x10f   : > { %p897_p9 = pneg %p896_p7 }
 0x110   : > { %p903_p0 = por %p902_p13, %p901_p12 }
 0x112   : > { %p904_p1 = pnand %p903_p0, %p897_p9 }
 0x114   : > { %907 = shalt.err (!%p904_p1)
}
 0x115   : > { %823 = dma.vmem_to_hbm [thread:$0]  (%p1023_p4), %s1062_s18, 128, %s1060_s23, %s669_s26  }
 0x116 PF: > { %p829_p2 = scmp.ge.s32.totalorder %s958_s17, 2  ;;  %s695_s9 = sand.u32 1, %s938_s12  }
 0x117   : > { %s696_s10 = scalar_lea.sflag [#allocation3], %s695_s9 }
 0x118   : > { %p826_p3 = pnand %p829_p2, %p1030_p8 }
 0x11a   : > { %933 = dma.done.wait (!%p826_p3), %s696_s10, 128  }
 0x11b   : > { %935 = vsyncadd (!%p826_p3), %s696_s10, 4294967168  ;;  %s16_s17 = sadd.s32 1, %s958_s17   ;;  %s1113_s12 = smov %s942_s13 }
 0x11c   : > { %p13_p5 = scmp.ge.s32.totalorder %s16_s17, 4   ;;  %s1114_s13 = smov %s946_s14 }
 0x11d   : > { %s1115_s14 = smov %s1036_s25  ;;  %s1116_s15 = smov %s954_s16 }
 0x11e   : > { %s1117_s16 = smov %s1119_s20  ;;  %15 = sbr.rel (!%p13_p5) target bundleno = 4 (0x4), region = 70 }
 0x125   :  { %701 = vsyncpa [#allocation3], 1 }
 0x126   :  { %703 = vsyncpa [#allocation3 + $0x1], 1 }

</bundles_post_ra>
